<compile_context>
chip_gen: v7x
topology: tpu7x:2x2x1
jax: 0.10.0
libtpu: 0.0.40
codegen_flags: <defaults>
</compile_context>

<pallas_src>
import functools

import jax
import jax.numpy as jnp
from jax import lax
from jax.experimental import pallas as pl
from jax.experimental.pallas import tpu as pltpu


def _wd_train_kernel(x_ref, w_ref, bits_ref, b_ref, o_ref, acc_ref, *,
                     threshold, scale):
    """One (i, j, k) grid step of y = x @ dropout(W).T + b (training mode)."""
    @pl.when(pl.program_id(2) == 0)
    def _():
        acc_ref[...] = jnp.zeros_like(acc_ref)

    # Dropout mask on this weight tile: keep iff bits >= p * 2^32.
    keep = bits_ref[...] >= jnp.uint32(threshold)
    w_masked = jnp.where(keep, w_ref[...], jnp.float32(0.0))

    # Contract x tile (tm, tk) with W tile (tn, tk) along dim 1 of both:
    # no transposed weight copy is materialized.
    acc_ref[...] += lax.dot_general(
        x_ref[...], w_masked,
        dimension_numbers=(((1,), (1,)), ((), ())),
        preferred_element_type=jnp.float32)

    @pl.when(pl.program_id(2) == pl.num_programs(2) - 1)
    def _():
        # Inverted-dropout 1/(1-p) scale folded into the epilogue, plus bias.
        o_ref[...] = (acc_ref[...] * jnp.float32(scale)
                      + b_ref[...]).astype(o_ref.dtype)


def _wd_eval_kernel(x_ref, w_ref, b_ref, o_ref, acc_ref):
    """Fast path (eval mode or dropout == 0): plain y = x @ W.T + b."""
    @pl.when(pl.program_id(2) == 0)
    def _():
        acc_ref[...] = jnp.zeros_like(acc_ref)

    acc_ref[...] += lax.dot_general(
        x_ref[...], w_ref[...],
        dimension_numbers=(((1,), (1,)), ((), ())),
        preferred_element_type=jnp.float32)

    @pl.when(pl.program_id(2) == pl.num_programs(2) - 1)
    def _():
        o_ref[...] = (acc_ref[...] + b_ref[...]).astype(o_ref.dtype)


def _round_up(a, m):
    return (a + m - 1) // m * m


def weight_drop_linear(x, w_raw, b, *, dropout=0.0, training=True, seed=0,
                       tm=None, tn=None, tk=None):
    """WeightDrop(Linear).forward: y = x @ dropout(w_raw).T + b."""
    batch, in_f = x.shape
    out_f, in_f2 = w_raw.shape
    assert in_f == in_f2, (x.shape, w_raw.shape)
    assert b.shape == (out_f,)
    assert 0.0 <= float(dropout) < 1.0

    # Tile sizes: (8, 128)-aligned, lane-dense output tiles, sized so that
    # double-buffered fp32 inputs stay well under the v7x VMEM budget.
    tm = tm if tm is not None else min(_round_up(batch, 8), 128)
    tn = tn if tn is not None else min(_round_up(out_f, 128), 256)
    tk = tk if tk is not None else min(_round_up(in_f, 128), 512)

    mp = _round_up(batch, tm)
    np_ = _round_up(out_f, tn)
    kp = _round_up(in_f, tk)

    x_p = x
    if (mp, kp) != (batch, in_f):
        x_p = jnp.zeros((mp, kp), x.dtype).at[:batch, :in_f].set(x)
    w_p = w_raw
    if (np_, kp) != (out_f, in_f):
        w_p = jnp.zeros((np_, kp), w_raw.dtype).at[:out_f, :in_f].set(w_raw)
    b_p = jnp.zeros((1, np_), b.dtype).at[0, :out_f].set(b)

    grid = (mp // tm, np_ // tn, kp // tk)

    x_spec = pl.BlockSpec((tm, tk), lambda i, j, k: (i, k))
    w_spec = pl.BlockSpec((tn, tk), lambda i, j, k: (j, k))
    bits_spec = pl.BlockSpec((tn, tk), lambda i, j, k: (j, k))
    b_spec = pl.BlockSpec((1, tn), lambda i, j, k: (0, j))
    o_spec = pl.BlockSpec((tm, tn), lambda i, j, k: (i, j))

    compiler_params = pltpu.CompilerParams(
        dimension_semantics=("parallel", "parallel", "arbitrary"),
        vmem_limit_bytes=32 * 1024 * 1024)

    use_dropout = training and float(dropout) > 0.0
    if use_dropout:
        p = float(dropout)
        # Random bits are a pure function of (seed, padded weight shape), so
        # each weight tile's mask is fixed across batch tiles / grid order.
        bits = jax.random.bits(jax.random.PRNGKey(seed), (np_, kp),
                               dtype=jnp.uint32)
        threshold = min(int(round(p * 2.0 ** 32)), 2 ** 32 - 1)
        kernel = functools.partial(_wd_train_kernel, threshold=threshold,
                                   scale=1.0 / (1.0 - p))
        in_specs = [x_spec, w_spec, bits_spec, b_spec]
        args = (x_p, w_p, bits, b_p)
    else:
        kernel = _wd_eval_kernel
        in_specs = [x_spec, w_spec, b_spec]
        args = (x_p, w_p, b_p)

    out = pl.pallas_call(
        kernel,
        out_shape=jax.ShapeDtypeStruct((mp, np_), x.dtype),
        grid=grid,
        in_specs=in_specs,
        out_specs=o_spec,
        scratch_shapes=[pltpu.VMEM((tm, tn), jnp.float32)],
        compiler_params=compiler_params,
    )(*args)

    if (mp, np_) != (batch, out_f):
        out = out[:batch, :out_f]
    return out


if __name__ == "__main__":
    # Small shapes consistent with WeightDrop(Linear(256, 256), ['weight'], 0.5)
    batch, in_features, out_features = 16, 256, 256
    dropout_p = 0.5
    seed = 42

    key = jax.random.PRNGKey(0)
    kx, kw, kb = jax.random.split(key, 3)
    x = jax.random.normal(kx, (batch, in_features), dtype=jnp.float32)
    # weight_raw parameter (registered as 'weight_raw' in the PyTorch module)
    w_raw = jax.random.normal(kw, (out_features, in_features),
                              dtype=jnp.float32) * 0.1
    b = jax.random.normal(kb, (out_features,), dtype=jnp.float32) * 0.1

    # Training path (dropout on the raw weight, inverted scaling).
    # Explicit small tiles so the demo exercises all three grid axes (2,2,2).
    y = weight_drop_linear(x, w_raw, b, dropout=dropout_p, training=True,
                           seed=seed, tm=8, tn=128, tk=128)
    y = jax.block_until_ready(y)
    assert y.shape == (batch, out_features)
    assert bool(jnp.all(jnp.isfinite(y)))

    # Pure-JAX reference with the identical mask (same seed/bits/threshold).
    bits_ref = jax.random.bits(jax.random.PRNGKey(seed),
                               (out_features, in_features), dtype=jnp.uint32)
    thr = jnp.uint32(min(int(round(dropout_p * 2.0 ** 32)), 2 ** 32 - 1))
    w_masked = jnp.where(bits_ref >= thr, w_raw, 0.0) / (1.0 - dropout_p)
    y_ref = x @ w_masked.T + b
    assert bool(jnp.allclose(y, y_ref, rtol=1e-3, atol=1e-3))

    # Eval path: dropout is identity (exact fast path, no RNG / masking).
    y_eval = weight_drop_linear(x, w_raw, b, dropout=dropout_p, training=False,
                                seed=seed, tm=8, tn=128, tk=128)
    y_eval = jax.block_until_ready(y_eval)
    assert bool(jnp.allclose(y_eval, x @ w_raw.T + b, rtol=1e-3, atol=1e-3))

    print("KERNEL_OK")
</pallas_src>

<mosaic_0001>
module attributes {stable_mosaic.version = 11 : i64} {
  func.func @_wd_train_kernel(%arg0: i32, %arg1: i32, %arg2: i32, %arg3: memref<8x128xf32, #tpu.memory_space<vmem>>, %arg4: memref<128x128xf32, #tpu.memory_space<vmem>>, %arg5: memref<128x128xi32, #tpu.memory_space<vmem>>, %arg6: memref<1x128xf32, #tpu.memory_space<vmem>>, %arg7: memref<8x128xf32, #tpu.memory_space<vmem>>, %arg8: memref<8x128xf32, #tpu.memory_space<vmem>>) attributes {dimension_semantics = [#tpu.dimension_semantics<parallel>, #tpu.dimension_semantics<parallel>, #tpu.dimension_semantics<arbitrary>], iteration_bounds = array<i64: 2, 2, 2>, scalar_prefetch = 0 : i64, scratch_operands = 1 : i64, tpu.core_type = #tpu.core_type<tc>, window_params = [{transform_indices = @transform_0, window_bounds = array<i64: 8, 128>}, {transform_indices = @transform_1, window_bounds = array<i64: 128, 128>}, {transform_indices = @transform_2, window_bounds = array<i64: 128, 128>}, {transform_indices = @transform_3, window_bounds = array<i64: 1, 128>}, {transform_indices = @transform_4, window_bounds = array<i64: 8, 128>}]} {
    %c0_i32 = arith.constant 0 : i32
    %0 = arith.cmpi eq, %arg2, %c0_i32 : i32
    %1 = arith.extui %0 : i1 to i32
    %c0_i32_0 = arith.constant 0 : i32
    %2 = arith.cmpi ne, %1, %c0_i32_0 : i32
    scf.if %2 {
      %cst_12 = arith.constant 0.000000e+00 : f32
      %17 = vector.broadcast %cst_12 : f32 to vector<8x128xf32>
      %c0_13 = arith.constant 0 : index
      %c0_14 = arith.constant 0 : index
      %18 = vector.load %arg8[%c0_13, %c0_14] : memref<8x128xf32, #tpu.memory_space<vmem>>, vector<8x128xf32>
      tpu.vector_store %arg8[%c0_13, %c0_14], %17 {strides = array<i32>} : memref<8x128xf32, #tpu.memory_space<vmem>>, vector<8x128xf32>,
    } else {
    }
    %c0 = arith.constant 0 : index
    %c0_1 = arith.constant 0 : index
    %3 = vector.load %arg5[%c0, %c0_1] : memref<128x128xi32, #tpu.memory_space<vmem>>, vector<128x128xi32>
    %c-2147483648_i32 = arith.constant -2147483648 : i32
    %4 = vector.broadcast %c-2147483648_i32 : i32 to vector<128x128xi32>
    %5 = arith.cmpi uge, %3, %4 : vector<128x128xi32>
    %c0_2 = arith.constant 0 : index
    %c0_3 = arith.constant 0 : index
    %6 = vector.load %arg4[%c0_2, %c0_3] : memref<128x128xf32, #tpu.memory_space<vmem>>, vector<128x128xf32>
    %cst = arith.constant 0.000000e+00 : f32
    %7 = vector.broadcast %cst : f32 to vector<128x128xf32>
    %8 = arith.select %5, %6, %7 : vector<128x128xi1>, vector<128x128xf32>
    %c0_4 = arith.constant 0 : index
    %c0_5 = arith.constant 0 : index
    %9 = vector.load %arg8[%c0_4, %c0_5] : memref<8x128xf32, #tpu.memory_space<vmem>>, vector<8x128xf32>
    %c0_6 = arith.constant 0 : index
    %c0_7 = arith.constant 0 : index
    %10 = vector.load %arg3[%c0_6, %c0_7] : memref<8x128xf32, #tpu.memory_space<vmem>>, vector<8x128xf32>
    %cst_8 = arith.constant dense<0.000000e+00> : vector<8x128xf32>
    %11 = tpu.matmul %10, %8, %cst_8 {dimension_numbers = #tpu.dot_dimension_numbers<[1], [1], [0], [0], [0, 0, 1, 0], [], []>} : vector<8x128xf32>, vector<128x128xf32>, vector<8x128xf32> -> vector<8x128xf32>
    %12 = arith.addf %9, %11 : vector<8x128xf32>
    %c0_9 = arith.constant 0 : index
    %c0_10 = arith.constant 0 : index
    %13 = vector.load %arg8[%c0_9, %c0_10] : memref<8x128xf32, #tpu.memory_space<vmem>>, vector<8x128xf32>
    tpu.vector_store %arg8[%c0_9, %c0_10], %12 {strides = array<i32>} : memref<8x128xf32, #tpu.memory_space<vmem>>, vector<8x128xf32>,
    %c1_i32 = arith.constant 1 : i32
    %14 = arith.cmpi eq, %arg2, %c1_i32 : i32
    %15 = arith.extui %14 : i1 to i32
    %c0_i32_11 = arith.constant 0 : i32
    %16 = arith.cmpi ne, %15, %c0_i32_11 : i32
    scf.if %16 {
      %c0_12 = arith.constant 0 : index
      %c0_13 = arith.constant 0 : index
      %17 = vector.load %arg8[%c0_12, %c0_13] : memref<8x128xf32, #tpu.memory_space<vmem>>, vector<8x128xf32>
      %cst_14 = arith.constant 2.000000e+00 : f32
      %18 = vector.broadcast %cst_14 : f32 to vector<8x128xf32>
      %19 = arith.mulf %17, %18 : vector<8x128xf32>
      %c0_15 = arith.constant 0 : index
      %c0_16 = arith.constant 0 : index
      %20 = vector.load %arg6[%c0_15, %c0_16] : memref<1x128xf32, #tpu.memory_space<vmem>>, vector<1x128xf32>
      %21 = vector.broadcast %20 : vector<1x128xf32> to vector<8x128xf32>
      %22 = arith.addf %19, %21 : vector<8x128xf32>
      %c0_17 = arith.constant 0 : index
      %c0_18 = arith.constant 0 : index
      %23 = vector.load %arg7[%c0_17, %c0_18] : memref<8x128xf32, #tpu.memory_space<vmem>>, vector<8x128xf32>
      tpu.vector_store %arg7[%c0_17, %c0_18], %22 {strides = array<i32>} : memref<8x128xf32, #tpu.memory_space<vmem>>, vector<8x128xf32>,
    } else {
    }
    return
  }
  func.func @transform_0(%arg0: i32, %arg1: i32, %arg2: i32) -> (i32, i32) {
    %c0_i32 = arith.constant 0 : i32
    return %arg0, %arg2 : i32, i32
  }
  func.func @transform_1(%arg0: i32, %arg1: i32, %arg2: i32) -> (i32, i32) {
    %c0_i32 = arith.constant 0 : i32
    return %arg1, %arg2 : i32, i32
  }
  func.func @transform_2(%arg0: i32, %arg1: i32, %arg2: i32) -> (i32, i32) {
    %c0_i32 = arith.constant 0 : i32
    return %arg1, %arg2 : i32, i32
  }
  func.func @transform_3(%arg0: i32, %arg1: i32, %arg2: i32) -> (i32, i32) {
    %c0_i32 = arith.constant 0 : i32
    %c0_i32_0 = arith.constant 0 : i32
    return %c0_i32, %arg1 : i32, i32
  }
  func.func @transform_4(%arg0: i32, %arg1: i32, %arg2: i32) -> (i32, i32) {
    %c0_i32 = arith.constant 0 : i32
    return %arg0, %arg1 : i32, i32
  }
}

</mosaic_0001>

<bundles_post_ra>
// kernel: tpu_custom_call.1
= control target key start
LH: loop header
LB: loop body
LE: loop exit
PB: predicated region body
PF: predicated region fallthrough
CT: control target
= control target key end

     0   :  { %s1716_s0 = inlined_call_operand.hbm [shape: f32[16,256], index: 0, kind: input, shape index: {}]   ;;  %s1717_s1 = inlined_call_operand.hbm [shape: f32[256,256], index: 1, kind: input, shape index: {}]   ;;  %s1718_s2 = inlined_call_operand.hbm [shape: u32[256,256], index: 2, kind: input, shape index: {}]   ;;  %s1719_s3 = inlined_call_operand.vmem [shape: f32[1,256], index: 3, kind: input, shape index: {}]   ;;  %s1720_s4 = inlined_call_operand.hbm [shape: f32[16,256], index: 4, kind: output, shape index: {}]  }
   0x1   :  { %1740 = sst [smem:[#allocation26_spill]] %s1717_s1 }
   0x2   :  { %1741 = sst [smem:[#allocation27_spill]] %s1718_s2 }
   0x3   :  { %1742 = sst [smem:[#allocation28_spill]] %s1719_s3 }
   0x4   :  { %1743 = sst [smem:[#allocation29_spill]] %s1720_s4 }
   0x5   :  { %9 = vsyncpa [#allocation4], 0 }
   0x6   :  { %11 = vsyncpa [#allocation4 + $0x1], 0 }
   0x7   :  { %12 = vsyncpa [#allocation7], 0 }
   0x8   :  { %14 = vsyncpa [#allocation7 + $0x1], 0 }
   0x9   :  { %15 = vsyncpa [#allocation5], 0 }
   0xa   :  { %17 = vsyncpa [#allocation5 + $0x1], 0  ;;  %s1243_s15 = smov 0   ;;  %s1245_s16 = smov 0  }
   0xb   :  { %s1247_s17 = smov 0   ;;  %s1249_s18 = smov 0  }
   0xc   :  { %s1251_s19 = smov 0   ;;  %s1253_s20 = smov 0  }
   0xd   :  { %s1255_s21 = smov 0   ;;  %s1257_s22 = smov 0  }
   0xe   :  { %s1259_s23 = smov 0   ;;  %s1261_s24 = smov 0  }
   0xf   :  { %s1263_s25 = smov 0   ;;  %s1265_s26 = smov 0  }
  0x10   :  { %s1267_s27 = smov 0   ;;  %s1269_s28 = smov 0  }
  0x11   :  { %s1271_s29 = smov 0   ;;  %s1273_s30 = smov 0  }
  0x12 LB: > { %1744 = sst [smem:[#allocation13_spill]] %s1153_s17  ;;  %p59_p0 = scmp.eq.s32.totalorder %s1205_s30, 0  ;;  %s1205_s30 = sphi %s1273_s30, %s23_s30   ;;  %s1201_s29 = sphi %s1271_s29, %s1811_s29   ;;  %s1197_s28 = sphi %s1269_s28, %s1810_s28   ;;  %s1193_s27 = sphi %s1267_s27, %s1809_s27   ;;  %s1189_s26 = sphi %s1265_s26, %s1808_s26   ;;  %s1185_s25 = sphi %s1263_s25, %s1807_s25   ;;  %s1181_s24 = sphi %s1261_s24, %s1806_s24   ;;  %s1177_s23 = sphi %s1259_s23, %s1805_s23   ;;  %s1173_s22 = sphi %s1257_s22, %s1804_s22   ;;  %s1169_s21 = sphi %s1255_s21, %s1803_s21   ;;  %s1165_s20 = sphi %s1253_s20, %s1793_s20   ;;  %s1161_s19 = sphi %s1251_s19, %s1802_s19   ;;  %s1157_s18 = sphi %s1249_s18, %s1801_s18   ;;  %s1153_s17 = sphi %s1247_s17, %s1791_s17   ;;  %s1149_s16 = sphi %s1245_s16, %s1800_s16   ;;  %s1145_s15 = sphi %s1243_s15, %s1799_s15  }
  0x13   : > { %1745 = sst [smem:[#allocation14_spill]] %s1165_s20  ;;  %p86_p1 = scmp.ne.s32.totalorder %s1165_s20, %s1161_s19 }
  0x14   : > { %1746 = sst [smem:[#allocation15_spill]] %s1181_s24  ;;  %p1723_p2 = scmp.lt.s32.totalorder %s1205_s30, 8 }
  0x15   : > { %1747 = sst [smem:[#allocation16_spill]] %s1185_s25  ;;  %s218_s6 = sand.u32 1, %s1205_s30  }
  0x16   : > { %1748 = sst [smem:[#allocation17_spill]] %s1189_s26  ;;  %p88_p3 = por %p86_p1, %p59_p0 }
  0x17   : > { %1749 = sst [smem:[#allocation18_spill]] %s1197_s28  ;;  %s220_s7 = sand.u32 1, %s1165_s20  }
  0x18   : > { %s704_s8 = sshll.u32 %s1197_s28, 5  ;;  %s1333_s9 = sshll.u32 %s220_s7, 7 }
  0x19   : > { %s1336_s10 = sadd.s32 %s1193_s27, %s704_s8  ;;  %s1750_s1 = sld [smem:[#allocation26_spill]] }
  0x1a   : > { %s1722_s11 = sshll.u32 %s1336_s10, 7  ;;  %s222_s5 = scalar_lea.vmem [#allocation6], %s1333_s9 }
  0x1b   : > { %s231_s4 = sshll.u32 %s222_s5, 4  ;;  %p1351_p4 = pnand %p1723_p2, %p88_p3  ;;  %s1347_s4 = int_to_ptr.vmem [resolvable:$true] %s231_s4 }
  0x1c   : > { %s1355_s8 = scalar_lea.sflag [#allocation7], %s218_s6 }
  0x1d   : > { %p951_p6 = pneg %p1351_p4 }
  0x1f   : > { %s1344_s14 = scalar_lea.hbm %s1750_s1, %s1722_s11  ;;  %s954_s11 = scalar_lea.hbm %s1750_s1, 8192 }
  0x20   : > { %s949_s12 = scalar_lea.hbm %s1344_s14, 2048  ;;  %p955_p9 = scmp.lt.u32.totalorder %s1344_s14, %s1750_s1 }
  0x21   : > { %p950_p5 = scmp.ne.s32.totalorder %s1344_s14, %s949_s12  ;;  %p956_p10 = scmp.lt.u32.totalorder %s954_s11, %s949_s12 }
  0x22   : > { %p958_p12 = scmp.lt.u32.totalorder %s949_s12, %s1344_s14 }
  0x23   : > { %p952_p7 = pnand %p951_p6, %p950_p5  ;;  %p957_p11 = por %p956_p10, %p955_p9 }
  0x25   : > { %p953_p8 = pneg %p952_p7  ;;  %p959_p13 = por %p958_p12, %p957_p11 }
  0x27   : > { %p960_p1 = pnand %p959_p13, %p953_p8 }
  0x29   : > { %963 = shalt.err (!%p960_p1)
}
  0x2a   : > { %s964_s6 = scalar_lea.vmem %s1347_s4, 2048  ;;  %s1207_s5 = smov [#allocation6]  }
  0x2b   : > { %p965_p3 = scmp.ne.s32.totalorder %s1347_s4, %s964_s6  ;;  %s969_s13 = sshll.u32 %s1207_s5, 4  ;;  %s970_s13 = int_to_ptr.vmem [resolvable:$false] %s969_s13 }
  0x2c   : > { %s971_s24 = scalar_lea.vmem %s970_s13, 4096  ;;  %p972_p2 = scmp.lt.s32.totalorder %s1347_s4, %s970_s13 }
  0x2d   : > { %p967_p5 = pnand %p965_p3, %p951_p6  ;;  %p973_p9 = scmp.lt.s32.totalorder %s971_s24, %s964_s6 }
  0x2f   : > { %p968_p7 = pneg %p967_p5  ;;  %p974_p10 = por %p973_p9, %p972_p2 }
  0x31   : > { %p975_p11 = pnand %p974_p10, %p968_p7 }
  0x33   : > { %978 = shalt.err (!%p975_p11)
}
  0x34   : > { %s1724_s26 = smov 256   ;;  %s1725_s11 = smov 128  }
  0x35   : > { %s1726_s12 = smov 8   ;;  %s1752_s6 = sshll.u32 %s1336_s10, 7 }
  0x36   : > { %804 = dma.hbm_to_vmem [thread:$0]  (!%p1351_p4), %s1344_s14, 2048, %s1347_s4, %s1355_s8, %s1724_s26, %s1725_s11, %s1726_s12  }
  0x37   : > { %s1753_s2 = sld [smem:[#allocation27_spill]]  ;;  %s245_s1 = scalar_lea.vmem [#allocation8], %s1333_s9 }
  0x38   : > { %s254_s3 = sshll.u32 %s245_s1, 4  ;;  %p675_p2 = scmp.ge.s32.totalorder %s1205_s30, 1  ;;  %s1395_s3 = int_to_ptr.vmem [resolvable:$true] %s254_s3 }
  0x39   : > { %p268_p8 = scmp.lt.s32.totalorder %s1205_s30, 9  ;;  %s1403_s10 = sadd.s32 4294967295, %s1205_s30  }
  0x3a   : > { %s35_s9 = sadd.s32 1, %s1193_s27  ;;  %s38_s1 = sadd.s32 1, %s1197_s28 }
  0x3b   : > { %p1398_p12 = pnand %p675_p2, %p268_p8  ;;  %p36_p13 = scmp.ge.s32.totalorder %s35_s9, 2 }
  0x3c   : > { %s51_s5 = sadd.s32 1, %s1177_s23  ;;  %p58_p1 = scmp.ne.s32.totalorder %s1177_s23, %s1173_s22 }
  0x3d   : > { %s1391_s24 = scalar_lea.hbm %s1753_s2, %s1752_s6  ;;  %s42_s6 = sadd.s32 1, %s1201_s29 }
  0x3e   : > { %s1754_s4 = scalar_select %p1398_p12, 1, 0 }
  0x3f   : > { %s1813_s9 = smov (%p36_p13, %s35_s9), 0  ;;  %s1815_s1 = smov (!%p36_p13, %s38_s1), %s1197_s28 }
  0x40   : > { %1755 = sst [smem:[#allocation19_spill]] %s1813_s9  ;;  %s47_s13 = ssub.s32 %s1193_s27, %s1813_s9 }
  0x41   : > { %p40_p3 = scmp.ge.s32.totalorder %s1815_s1, 2  ;;  %p64_p5 = scmp.ne.s32.totalorder %s1173_s22, %s1169_s21 }
  0x42   : > { %p1421_p7 = por %p59_p0, %p58_p1  ;;  %p65_p9 = scmp.eq.s32.totalorder %s1403_s10, 0 }
  0x43   : > { %s1817_s1 = smov (%p40_p3, %s1815_s1), 0  ;;  %s1819_s6 = smov (!%p40_p3, %s42_s6), %s1201_s29 }
  0x44   : > { %1757 = sst [smem:[#allocation20_spill]] %s1817_s1  ;;  %p1429_p10 = por %p65_p9, %p64_p5 }
  0x45   : > { %s74_s12 = ssub.s32 %s1197_s28, %s1817_s1  ;;  %p44_p11 = scmp.ge.s32.totalorder %s1819_s6, 2 }
  0x46   : > { %s1758_s11 = scalar_select %p1429_p10, 1, 0 }
  0x47   : > { %s76_s21 = sor.u32 %s74_s12, %s47_s13  ;;  %p92_p2 = scmp.ne.s32.totalorder %s1161_s19, %s1157_s18 }
  0x48   : > { %1759 = sst [smem:[#allocation21_spill]] %s1758_s11  ;;  %p77_p0 = scmp.eq.s32.totalorder %s76_s21, 0 }
  0x49   : > { %s1821_s6 = smov (%p44_p11, %s1819_s6), 0  ;;  %s1761_s14 = sadd.s32 1, %s1165_s20 }
  0x4a   : > { %1760 = sst [smem:[#allocation22_spill]] %s1821_s6  ;;  %s46_s25 = ssub.s32 %s1201_s29, %s1821_s6 }
  0x4b   : > { %s1442_s9 = scalar_select %p77_p0, %s1165_s20, %s1761_s14  }
  0x4c   : > { %p1446_p8 = por %p92_p2, %p65_p9  ;;  %s48_s28 = sor.u32 %s47_s13, %s46_s25 }
  0x4d   : > { %1762 = sst [smem:[#allocation23_spill]] %s1442_s9  ;;  %s158_s11 = sor.u32 %s74_s12, %s46_s25 }
  0x4e   : > { %s1763_s1 = scalar_select %p1446_p8, 1, 0 }
  0x4f   : > { %p49_p13 = scmp.eq.s32.totalorder %s48_s28, 0  ;;  %p159_p1 = scmp.eq.s32.totalorder %s158_s11, 0 }
  0x50   : > { %s161_s18 = sadd.s32 1, %s1153_s17  ;;  %p171_p3 = scmp.ne.s32.totalorder %s1153_s17, %s1149_s16 }
  0x51   : > { %s1454_s21 = scalar_select %p49_p13, %s1177_s23, %s51_s5  }
  0x52   : > { %s1457_s14 = scalar_select %p159_p1, %s1153_s17, %s161_s18  }
  0x53   : > { %1764 = sst [smem:[#allocation24_spill]] %s1454_s21  ;;  %p172_p5 = scmp.eq.s32.totalorder %s1403_s10, 7 }
  0x54   : > { %1765 = sst [smem:[#allocation25_spill]] %s1457_s14  ;;  %p177_p9 = scmp.ne.s32.totalorder %s1149_s16, %s1145_s15 }
  0x55   : > { %s1766_s6 = sadd.s32 4294967294, %s1205_s30   ;;  %s1736_s13 = sand.u32 1, %s1177_s23  }
  0x56   : > { %p178_p11 = scmp.eq.s32.totalorder %s1766_s6, 7  ;;  %p1465_p0 = por %p172_p5, %p171_p3 }
  0x57   : > { %s664_s11 = sshll.u32 %s1736_s13, 3  ;;  %s665_s12 = sshll.u32 %s1201_s29, 1 }
  0x58   : > { %s1767_s25 = scalar_select %p1465_p0, 1, 0 }
  0x59   : > { %p1469_p2 = por %p178_p11, %p177_p9  ;;  %s207_s5 = sadd.s32 %s1193_s27, %s665_s12 }
  0x5a   : > { %s202_s18 = scalar_lea.vmem [#allocation3], %s664_s11  ;;  %s666_s9 = sshll.u32 %s207_s5, 7 }
  0x5b   : > { %s1768_s28 = scalar_select %p1469_p2, 1, 0 }
  0x5c   : > { %s211_s21 = sshll.u32 %s202_s18, 4  ;;  %s1482_s14 = scalar_lea.hbm %s1716_s0, %s666_s9  ;;  %s1477_s21 = int_to_ptr.vmem [resolvable:$true] %s211_s21 }
  0x5d   : > { %p1769_p13 = scmp.lt.s32.totalorder %s1205_s30, 8  ;;  %s979_s13 = scalar_lea.hbm %s1391_s24, 2048 }
  0x5e   : > { %p980_p3 = scmp.ne.s32.totalorder %s1391_s24, %s979_s13  ;;  %s984_s5 = scalar_lea.hbm %s1753_s2, 8192 }
  0x5f   : > { %p1488_p1 = pnand %p1769_p13, %p1421_p7  ;;  %p985_p11 = scmp.lt.u32.totalorder %s1391_s24, %s1753_s2 }
  0x60   : > { %p982_p5 = pnand %p980_p3, %p951_p6  ;;  %p986_p2 = scmp.lt.u32.totalorder %s984_s5, %s979_s13 }
  0x61   : > { %p988_p7 = scmp.lt.u32.totalorder %s979_s13, %s1391_s24 }
  0x62   : > { %p983_p9 = pneg %p982_p5  ;;  %p987_p0 = por %p986_p2, %p985_p11 }
  0x64   : > { %p989_p13 = por %p988_p7, %p987_p0 }
  0x66   : > { %p990_p8 = pnand %p989_p13, %p983_p9 }
  0x68   : > { %993 = shalt.err (!%p990_p8)
}
  0x69   : > { %s994_s26 = scalar_lea.vmem %s1395_s3, 2048  ;;  %s1211_s9 = smov [#allocation8]  }
  0x6a   : > { %p995_p3 = scmp.ne.s32.totalorder %s1395_s3, %s994_s26  ;;  %s999_s6 = sshll.u32 %s1211_s9, 4  ;;  %s1000_s6 = int_to_ptr.vmem [resolvable:$false] %s999_s6 }
  0x6b   : > { %s1001_s11 = scalar_lea.vmem %s1000_s6, 4096  ;;  %p1002_p12 = scmp.lt.s32.totalorder %s1395_s3, %s1000_s6 }
  0x6c   : > { %p997_p5 = pnand %p995_p3, %p951_p6  ;;  %p1003_p2 = scmp.lt.s32.totalorder %s1001_s11, %s994_s26 }
  0x6e   : > { %p998_p10 = pneg %p997_p5  ;;  %p1004_p11 = por %p1003_p2, %p1002_p12 }
  0x70   : > { %p1005_p0 = pnand %p1004_p11, %p998_p10 }
  0x72   : > { %1008 = shalt.err (!%p1005_p0)
}
  0x73   : > { %s1771_s13 = smov 8   ;;  %s1772_s12 = smov 128  }
  0x74   : > { %s1773_s5 = smov 256   ;;  %s1774_s18 = sand.u32 1, %s1177_s23  }
  0x75   : > { %807 = dma.hbm_to_vmem [thread:$0]  (!%p1351_p4), %s1391_s24, 2048, %s1395_s3, %s1355_s8, %s1773_s5, %s1772_s12, %s1771_s13  }
  0x76   : > { %s199_s20 = scalar_lea.sflag [#allocation4], %s1774_s18  ;;  %s1009_s26 = scalar_lea.hbm %s1482_s14, 128 }
  0x77   : > { %p1010_p6 = scmp.ne.s32.totalorder %s1482_s14, %s1009_s26  ;;  %p1011_p12 = pneg %p1488_p1 }
  0x78   : > { %s1014_s6 = scalar_lea.hbm %s1716_s0, 512  ;;  %p1015_p9 = scmp.lt.u32.totalorder %s1482_s14, %s1716_s0 }
  0x79   : > { %p1012_p10 = pnand %p1011_p12, %p1010_p6  ;;  %p1016_p7 = scmp.lt.u32.totalorder %s1014_s6, %s1009_s26 }
  0x7a   : > { %p1018_p13 = scmp.lt.u32.totalorder %s1009_s26, %s1482_s14 }
  0x7b   : > { %p1013_p8 = pneg %p1012_p10  ;;  %p1017_p4 = por %p1016_p7, %p1015_p9 }
  0x7d   : > { %p1019_p3 = por %p1018_p13, %p1017_p4 }
  0x7f   : > { %p1020_p5 = pnand %p1019_p3, %p1013_p8 }
  0x81   : > { %1023 = shalt.err (!%p1020_p5)
}
  0x82   : > { %s1024_s3 = scalar_lea.vmem %s1477_s21, 128  ;;  %s1212_s8 = smov [#allocation3]  }
  0x83   : > { %p1025_p2 = scmp.ne.s32.totalorder %s1477_s21, %s1024_s3  ;;  %s1029_s24 = sshll.u32 %s1212_s8, 4  ;;  %s1030_s24 = int_to_ptr.vmem [resolvable:$false] %s1029_s24 }
  0x84   : > { %s1031_s2 = scalar_lea.vmem %s1030_s24, 256  ;;  %p1032_p6 = scmp.lt.s32.totalorder %s1477_s21, %s1030_s24 }
  0x85   : > { %p1027_p11 = pnand %p1025_p2, %p1011_p12  ;;  %p1033_p10 = scmp.lt.s32.totalorder %s1031_s2, %s1024_s3 }
  0x87   : > { %p1028_p0 = pneg %p1027_p11  ;;  %p1034_p9 = por %p1033_p10, %p1032_p6 }
  0x89   : > { %p1035_p7 = pnand %p1034_p9, %p1028_p0 }
  0x8b   : > { %1038 = shalt.err (!%p1035_p7)
}
  0x8c   : > { %801 = dma.hbm_to_vmem [thread:$0]  (!%p1488_p1), %s1482_s14, 128, %s1477_s21, %s199_s20  }
  0x8d   : > { %p1775_p8 = scmp.ne.s32.totalorder %s1754_s4, 0 }
  0x8e   : > { %s1776_s13 = sld [smem:[#allocation21_spill]] (!%p1775_p8)  ;;  %s274_s12 = sand.u32 (!%p1775_p8), 1, %s1173_s22  }
  0x8f   : > { %272 = sbr.rel (%p1775_p8) target bundleno = 496 (0x1f0), region = 36  ;;  %s1549_s5 = sshll.u32 (!%p1775_p8), %s274_s12, 3 }
  0x90   : > { %s275_s18 = scalar_lea.sflag (!%p1775_p8), [#allocation4], %s274_s12  ;;  %s278_s26 = scalar_lea.vmem (!%p1775_p8), [#allocation3], %s1549_s5 }
  0x94   : > { %p1777_p12 = scmp.ne.s32.totalorder (!%p1775_p8), %s1776_s13, 0 }
  0x96   : > { %1132 = dma.done.wait (%p1777_p12), %s275_s18, 128  }
  0x97   : > { %1134 = vsyncadd (%p1777_p12), %s275_s18, 4294967168  ;;  %s283_s17 = sand.u32 1, %s1403_s10   ;;  %s285_s21 = sand.u32 1, %s1161_s19  }
  0x98   : > { %s677_s4 = sshll.u32 %s285_s21, 7  ;;  %s284_s14 = scalar_lea.sflag [#allocation7], %s283_s17 }
  0x99   : > { %s1558_s20 = scalar_lea.vmem [#allocation6], %s677_s4  ;;  %p1778_p1 = scmp.ne.s32.totalorder %s1763_s1, 0 }
  0x9b   : > { %1136 = dma.done.wait (%p1778_p1), %s284_s14, 4096  }
  0x9c   : > { %1138 = vsyncadd (%p1778_p1), %s284_s14, 4294963200  ;;  %s1779_s7 = sld [smem:[#allocation16_spill]]  ;;  %s331_s9 = sand.u32 1, %s1149_s16  }
  0x9d   : > { %s1567_s6 = sshll.u32 %s331_s9, 3  ;;  %s1780_s3 = sld [smem:[#allocation28_spill]] }
  0x9e   : > { %s1577_s24 = scalar_lea.vmem [#allocation8], %s677_s4  ;;  %s333_s1 = scalar_lea.vmem [#allocation9], %s1567_s6 }
  0x9f   : > { %s1781_s2 = sld [smem:[#allocation15_spill]] }
  0xa2   : > { %p336_p4 = scmp.lt.s32.totalorder %s1779_s7, 1 }
  0xa4   : > { %s1823_s7 = smov (!%p336_p4, %s1779_s7), 1 }
  0xa5   : > { %s338_s8 = scalar_lea.vmem %s1780_s3, %s1823_s7  ;;  %p680_p13 = scmp.ne.s32.totalorder %s1781_s2, 0 }
  0xa6   : > { %v1213_v0 = vmov (!%p680_p13), 0.0  }
  0xa7   : > { %342 = sbr.rel (%p680_p13) target bundleno = 174 (0xae), region = 52  ;;  %343 = vst [vmem:[#allocation2] sm:$0xff] (!%p680_p13), %v1213_v0 }
  0xae PF: > { %v344_v1 = vld [vmem:[%s1577_s24] sm:$0xff]  ;;  %v345_v2 = vld [vmem:[%s1577_s24 + $0x8] sm:$0xff]  ;;  %v1214_v4 = vmov 0.0|0.0   ;;  %vm1215_vm2 = vmmov 0   ;;  %v1216_v6 = vmov 0.0   ;;  %v346_v8 = vld [vmem:[%s1577_s24 + $0x10] sm:$0xff] }
  0xaf   : > { %v376_v3 = vld [vmem:[%s1558_s20] sm:$0xff]  ;;  %758 = vmatprep.subr.bf16.mxu0 %v1214_v4  ;;  %vm360_vm0 = vcmp.ge.u32.totalorder %v344_v1, 2147483648  ;;  %vm361_vm1 = vcmp.ge.u32.totalorder %v345_v2, 2147483648  ;;  %v377_v5 = vld [vmem:[%s1558_s20 + $0x8] sm:$0xff]  ;;  %755 = vmatprep.mubr.msk.f32.mxu0 %vm1215_vm2, %v1216_v6  ;;  %v347_v9 = vld [vmem:[%s1577_s24 + $0x18] sm:$0xff]  ;;  %vm362_vm4 = vcmp.ge.u32.totalorder %v346_v8, 2147483648 }
  0xb0   : > { %v759_v7 = vpack.c.bf16 %v377_v5, %v376_v3  ;;  %vm760_vm3 = vmpackc.low %vm361_vm1, %vm360_vm0  ;;  %v378_v10 = vld [vmem:[%s1558_s20 + $0x10] sm:$0xff]  ;;  %v379_v11 = vld [vmem:[%s1558_s20 + $0x18] sm:$0xff]  ;;  %vm363_vm5 = vcmp.ge.u32.totalorder %v347_v9, 2147483648  ;;  %s1782_s13 = sld [smem:[#allocation15_spill]] }
  0xb1   : > { %v763_v12 = vpack.c.bf16 %v379_v11, %v378_v10  ;;  %vm764_vm6 = vmpackc.low %vm363_vm5, %vm362_vm4  ;;  %v348_v13 = vld [vmem:[%s1577_s24 + $0x20] sm:$0xff]  ;;  %v349_v14 = vld [vmem:[%s1577_s24 + $0x28] sm:$0xff] }
  0xb2   : > { %761 = vmatpush3.bf16.xpose.msk.msra.mxu0 %vm760_vm3, %v759_v7  ;;  %v380_v15 = vld [vmem:[%s1558_s20 + $0x20] sm:$0xff]  ;;  %v381_v16 = vld [vmem:[%s1558_s20 + $0x28] sm:$0xff]  ;;  %vm364_vm7 = vcmp.ge.u32.totalorder %v348_v13, 2147483648  ;;  %vm365_vm8 = vcmp.ge.u32.totalorder %v349_v14, 2147483648  ;;  %v350_v18 = vld [vmem:[%s1577_s24 + $0x30] sm:$0xff] }
  0xb3   : > { %762 = vmatprep.subr.bf16.mxu0 %v1214_v4  ;;  %v767_v17 = vpack.c.bf16 %v381_v16, %v380_v15  ;;  %vm768_vm9 = vmpackc.low %vm365_vm8, %vm364_vm7  ;;  %v351_v19 = vld [vmem:[%s1577_s24 + $0x38] sm:$0xff]  ;;  %v382_v20 = vld [vmem:[%s1558_s20 + $0x30] sm:$0xff]  ;;  %vm366_vm10 = vcmp.ge.u32.totalorder %v350_v18, 2147483648 }
  0xb4   : > { %v383_v21 = vld [vmem:[%s1558_s20 + $0x38] sm:$0xff]  ;;  %vm367_vm11 = vcmp.ge.u32.totalorder %v351_v19, 2147483648  ;;  %v352_v23 = vld [vmem:[%s1577_s24 + $0x40] sm:$0xff]  ;;  %v353_v24 = vld [vmem:[%s1577_s24 + $0x48] sm:$0xff] }
  0xb5   : > { %v771_v22 = vpack.c.bf16 %v383_v21, %v382_v20  ;;  %vm772_vm12 = vmpackc.low %vm367_vm11, %vm366_vm10  ;;  %v384_v25 = vld [vmem:[%s1558_s20 + $0x40] sm:$0xff]  ;;  %v385_v26 = vld [vmem:[%s1558_s20 + $0x48] sm:$0xff]  ;;  %vm368_vm13 = vcmp.ge.u32.totalorder %v352_v23, 2147483648  ;;  %vm369_vm14 = vcmp.ge.u32.totalorder %v353_v24, 2147483648 }
  0xb6   : > { %v775_v27 = vpack.c.bf16 %v385_v26, %v384_v25  ;;  %vm776_vm15 = vmpackc.low %vm369_vm14, %vm368_vm13  ;;  %v354_v28 = vld [vmem:[%s1577_s24 + $0x50] sm:$0xff]  ;;  %v355_v29 = vld [vmem:[%s1577_s24 + $0x58] sm:$0xff]  ;;  %p697_p3 = scmp.ne.s32.totalorder %s1782_s13, 1 }
  0xb7   : > { %v386_v30 = vld [vmem:[%s1558_s20 + $0x50] sm:$0xff]  ;;  %v387_v31 = vld [vmem:[%s1558_s20 + $0x58] sm:$0xff]  ;;  %vm370_vm0 = vcmp.ge.u32.totalorder %v354_v28, 2147483648  ;;  %vm371_vm1 = vcmp.ge.u32.totalorder %v355_v29, 2147483648  ;;  %v356_v33 = vld [vmem:[%s1577_s24 + $0x60] sm:$0xff] }
  0xb8   : > { %v779_v32 = vpack.c.bf16 %v387_v31, %v386_v30  ;;  %vm780_vm2 = vmpackc.low %vm371_vm1, %vm370_vm0  ;;  %v357_v34 = vld [vmem:[%s1577_s24 + $0x68] sm:$0xff]  ;;  %v388_v35 = vld [vmem:[%s1558_s20 + $0x60] sm:$0xff]  ;;  %vm372_vm3 = vcmp.ge.u32.totalorder %v356_v33, 2147483648 }
  0xb9   : > { %v389_v36 = vld [vmem:[%s1558_s20 + $0x68] sm:$0xff]  ;;  %vm373_vm4 = vcmp.ge.u32.totalorder %v357_v34, 2147483648  ;;  %v358_v38 = vld [vmem:[%s1577_s24 + $0x70] sm:$0xff]  ;;  %v359_v39 = vld [vmem:[%s1577_s24 + $0x78] sm:$0xff] }
  0xba   : > { %765 = vmatpush3.bf16.xpose.msk.msra.mxu0 %vm764_vm6, %v763_v12  ;;  %v783_v37 = vpack.c.bf16 %v389_v36, %v388_v35  ;;  %vm784_vm5 = vmpackc.low %vm373_vm4, %vm372_vm3  ;;  %v390_v40 = vld [vmem:[%s1558_s20 + $0x70] sm:$0xff]  ;;  %v391_v41 = vld [vmem:[%s1558_s20 + $0x78] sm:$0xff]  ;;  %vm374_vm6 = vcmp.ge.u32.totalorder %v358_v38, 2147483648  ;;  %vm375_vm7 = vcmp.ge.u32.totalorder %v359_v39, 2147483648 }
  0xbb   : > { %766 = vmatprep.subr.bf16.mxu0 %v1214_v4  ;;  %v787_v42 = vpack.c.bf16 %v391_v41, %v390_v40  ;;  %vm788_vm8 = vmpackc.low %vm375_vm7, %vm374_vm6  ;;  %v409_v43 = vld [vmem:[%s278_s26] sm:$0xff]  ;;  %v408_v44 = vld [vmem:[#allocation2] sm:$0xff] }
  0xbc   : > { %v698_v49 = vld [vmem:[%s338_s8] ss:$0 sm:$0xff] (!%p697_p3) }
  0xc2   : > { %769 = vmatpush3.bf16.xpose.msk.msra.mxu0 %vm768_vm9, %v767_v17 }
  0xc3   : > { %770 = vmatprep.subr.bf16.mxu0 %v1214_v4 }
  0xca   : > { %773 = vmatpush3.bf16.xpose.msk.msra.mxu0 %vm772_vm12, %v771_v22 }
  0xcb   : > { %774 = vmatprep.subr.bf16.mxu0 %v1214_v4 }
  0xd2   : > { %777 = vmatpush3.bf16.xpose.msk.msra.mxu0 %vm776_vm15, %v775_v27 }
  0xd3   : > { %778 = vmatprep.subr.bf16.mxu0 %v1214_v4 }
  0xda   : > { %781 = vmatpush3.bf16.xpose.msk.msra.mxu0 %vm780_vm2, %v779_v32 }
  0xdb   : > { %782 = vmatprep.subr.bf16.mxu0 %v1214_v4 }
  0xe2   : > { %785 = vmatpush3.bf16.xpose.msk.msra.mxu0 %vm784_vm5, %v783_v37 }
  0xe3   : > { %786 = vmatprep.subr.bf16.mxu0 %v1214_v4 }
  0xea   : > { %789 = vmatpush3.bf16.xpose.msk.msra.mxu0 %vm788_vm8, %v787_v42 }
  0xf1   : > { %756 = vmatmul.mubr.f32.vlgmr.msra.gmra.mrb[0].mxu0 %v409_v43 }
 0x1c1   : > { %485 = sbr.rel (%p697_p3) target bundleno = 468 (0x1d4), region = 56 }
 0x1c4   : > { %v476_v45 = vpop.f32.mrb[0].mxu0 }
 0x1c5   : > { %v480_v46 = vadd.f32 %v476_v45, %v408_v44  ;;  %v757_v47 = vpop.f32.mrb[1].mxu0 }
 0x1c7   : > { %481 = vst [vmem:[#allocation2] sm:$0xff] %v480_v46 }
 0x1ce   : > { %v486_v48 = vld [vmem:[#allocation2] sm:$0xff] }
 0x1cf   : > { %v487_v50 = vmul.f32 2.0, %v486_v48 }
 0x1d1   : > { %v495_v51 = vadd.f32 %v698_v49, %v487_v50 }
 0x1d3   : > { %496 = vst [vmem:[%s333_s1] sm:$0xff] %v495_v51 }
 0x1d4 PF: > { %s1784_s5 = sld [smem:[#allocation17_spill]]  ;;  %s1785_s26 = sld [smem:[#allocation16_spill]] }
 0x1d5   : > { %s513_s14 = sshll.u32 %s333_s1, 4  ;;  %s1786_s11 = sld [smem:[#allocation29_spill]]  ;;  %s1635_s14 = int_to_ptr.vmem [resolvable:$true] %s513_s14 }
 0x1d6   : > { %s498_s8 = scalar_lea.sflag [#allocation5], %s331_s9  ;;  %s1039_s24 = scalar_lea.vmem %s1635_s14, 128 }
 0x1d7   : > { %p1040_p5 = scmp.ne.s32.totalorder %s1635_s14, %s1039_s24  ;;  %p1787_p2 = scmp.ne.s32.totalorder %s1767_s25, 0 }
 0x1d8   : > { %s1217_s2 = smov [#allocation9]  }
 0x1d9   : > { %p1041_p11 = pnand %p1040_p5, %p1787_p2  ;;  %s1043_s6 = sshll.u32 %s1217_s2, 4  ;;  %s1044_s6 = int_to_ptr.vmem [resolvable:$false] %s1043_s6 }
 0x1da   : > { %s700_s21 = sshll.u32 %s1784_s5, 1  ;;  %s1045_s1 = scalar_lea.vmem %s1044_s6, 256 }
 0x1db   : > { %s509_s4 = sadd.s32 %s1785_s26, %s700_s21  ;;  %p1042_p0 = pneg %p1041_p11 }
 0x1dc   : > { %s701_s20 = sshll.u32 %s509_s4, 7  ;;  %p1046_p6 = scmp.lt.s32.totalorder %s1635_s14, %s1044_s6 }
 0x1dd   : > { %s511_s3 = scalar_lea.hbm %s1786_s11, %s701_s20  ;;  %p1047_p10 = scmp.lt.s32.totalorder %s1045_s1, %s1039_s24 }
 0x1df   : > { %p1048_p9 = por %p1047_p10, %p1046_p6 }
 0x1e1   : > { %p1049_p7 = pnand %p1048_p9, %p1042_p0 }
 0x1e3   : > { %1052 = shalt.err (!%p1049_p7)
}
 0x1e4   : > { %s1053_s13 = scalar_lea.hbm %s511_s3, 128  ;;  %s1057_s18 = scalar_lea.hbm %s1786_s11, 512 }
 0x1e5   : > { %p1054_p8 = scmp.ne.s32.totalorder %s511_s3, %s1053_s13  ;;  %p1058_p4 = scmp.lt.u32.totalorder %s511_s3, %s1786_s11 }
 0x1e6   : > { %p1059_p13 = scmp.lt.u32.totalorder %s1057_s18, %s1053_s13  ;;  %p1061_p5 = scmp.lt.u32.totalorder %s1053_s13, %s511_s3 }
 0x1e7   : > { %p1055_p12 = pnand %p1054_p8, %p1787_p2 }
 0x1e8   : > { %p1060_p3 = por %p1059_p13, %p1058_p4 }
 0x1e9   : > { %p1056_p1 = pneg %p1055_p12 }
 0x1ea   : > { %p1062_p11 = por %p1061_p5, %p1060_p3 }
 0x1ec   : > { %p1063_p0 = pnand %p1062_p11, %p1056_p1 }
 0x1ee   : > { %1066 = shalt.err (!%p1063_p0)
}
 0x1ef   : > { %796 = dma.vmem_to_hbm [thread:$0]  (%p1787_p2), %s1635_s14, 128, %s511_s3, %s498_s8  }
 0x1f0 PF: > { %p813_p6 = scmp.ge.s32.totalorder %s1205_s30, 2  ;;  %s525_s26 = sand.u32 1, %s1145_s15  }
 0x1f1   : > { %p1788_p10 = scmp.ne.s32.totalorder %s1768_s28, 0  ;;  %s526_s21 = scalar_lea.sflag [#allocation5], %s525_s26 }
 0x1f3   : > { %p809_p9 = pnand %p813_p6, %p1788_p10 }
 0x1f5   : > { %1140 = dma.done.wait (!%p809_p9), %s526_s21, 128  }
 0x1f6   : > { %1142 = vsyncadd (!%p809_p9), %s526_s21, 4294967168  ;;  %s23_s30 = sadd.s32 1, %s1205_s30   ;;  %s1790_s25 = sld [smem:[#allocation13_spill]] }
 0x1f7   : > { %p1663_p7 = scmp.ge.s32.totalorder %s23_s30, 10   ;;  %s1791_s17 = sld [smem:[#allocation25_spill]] }
 0x1f8   : > { %s1792_s14 = sld [smem:[#allocation14_spill]]  ;;  %s1793_s20 = sld [smem:[#allocation23_spill]] }
 0x1f9   : > { %s1794_s7 = sld [smem:[#allocation24_spill]]  ;;  %s1795_s28 = sld [smem:[#allocation18_spill]] }
 0x1fa   : > { %s1796_s10 = sld [smem:[#allocation19_spill]]  ;;  %s1797_s3 = sld [smem:[#allocation20_spill]] }
 0x1fb   : > { %s1798_s8 = sld [smem:[#allocation22_spill]]  ;;  %s1799_s15 = smov %s1149_s16 }
 0x1fc   : > { %s1800_s16 = smov %s1790_s25  ;;  %s1801_s18 = smov %s1161_s19 }
 0x1fd   : > { %s1803_s21 = smov %s1173_s22  ;;  %s1804_s22 = smov %s1177_s23 }
 0x1fe   : > { %s1802_s19 = smov %s1792_s14  ;;  %s1806_s24 = smov %s1193_s27 }
 0x1ff   : > { %s1805_s23 = smov %s1794_s7  ;;  %s1807_s25 = smov %s1795_s28 }
 0x200   : > { %s1808_s26 = smov %s1201_s29  ;;  %s1809_s27 = smov %s1796_s10 }
 0x201   : > { %s1810_s28 = smov %s1797_s3  ;;  %s1811_s29 = smov %s1798_s8 }
 0x202   :  { %22 = sbr.rel (!%p1663_p7) target bundleno = 18 (0x12), region = 116 }
 0x209   :  { %531 = vsyncpa [#allocation4], 1 }
 0x20a   :  { %533 = vsyncpa [#allocation4 + $0x1], 1 }
 0x20b   :  { %534 = vsyncpa [#allocation7], 1 }
 0x20c   :  { %536 = vsyncpa [#allocation7 + $0x1], 1 }
 0x20d   :  { %537 = vsyncpa [#allocation5], 1 }
 0x20e   :  { %539 = vsyncpa [#allocation5 + $0x1], 1 }

</bundles_post_ra>
